<compile_context>
chip_gen: v7x
topology: tpu7x:2x2x1
jax: 0.10.0
libtpu: 0.0.40
codegen_flags: <defaults>
</compile_context>

<pallas_src>
import jax
import jax.numpy as jnp
from jax.experimental import pallas as pl
from jax.experimental.pallas import tpu as pltpu

# ---- Config (consistent with the PyTorch module) -----------------------------
VOCAB = 50
EMBED_DIM = 32            # Config.embedding_dim
NUM_FILTERS = 8           # Config.num_filters
KERNEL_SIZES = (3, 4, 5)  # Config.kernel_sizes
NUM_CLASSES = 4           # Config.classes
SEQ_LEN = 16
BATCH = 2

K_MAX = max(KERNEL_SIZES)
N_TOK = BATCH * SEQ_LEN                     # collapsed (batch*time) rows
CONV_PAD = 128                              # lane-dense width for conv / fc / output
N_FEAT = len(KERNEL_SIZES) * NUM_FILTERS    # 24 real feature lanes
OUT_ROWS = max(8, (BATCH + 7) // 8 * 8)     # sublane-dense output / FC-M rows


def _ru16(x):
    return (x + 15) // 16 * 16


# Packed bf16 parameter slab row layout (all section offsets 16-row aligned).
CONV_W_ROW = 0                                           # K_MAX*E rows of per-tap conv weights
CONV_B_ROW = _ru16(CONV_W_ROW + K_MAX * EMBED_DIM)       # 160
FC_W_ROW = CONV_B_ROW + 16                               # 176
FC_B_ROW = FC_W_ROW + CONV_PAD                           # 304
SLAB_ROWS = FC_B_ROW + 16                                # 320


def textcnn_kernel(ids_ref, emb_ref, slab_ref, out_ref):
    """Fused gather, conv (all widths), ReLU, masked time-max, FC, log_softmax."""
    L, F = SEQ_LEN, NUM_FILTERS

    ids = ids_ref[...]                                               # (N_TOK, K_MAX) i32
    emb_tbl = emb_ref[...]                                           # (VOCAB, E) bf16
    vocab_iota = jax.lax.broadcasted_iota(jnp.int32, (N_TOK, VOCAB), 1)

    # --- embedding gather + conv: per-tap one-hot gather matmul + conv matmul --
    conv = jnp.zeros((N_TOK, CONV_PAD), jnp.float32)
    for k in range(K_MAX):                                           # static, K_MAX = 5
        eq = ids[:, k:k + 1] == vocab_iota                           # (N_TOK, VOCAB) bool
        onehot = eq.astype(jnp.float32).astype(jnp.bfloat16)         # 0/1 exact in bf16
        emb_k = jnp.dot(onehot, emb_tbl,
                        preferred_element_type=jnp.float32)          # (N_TOK, E) exact gather
        w_k = slab_ref[CONV_W_ROW + k * EMBED_DIM:
                       CONV_W_ROW + (k + 1) * EMBED_DIM, :]          # (E, 128) bf16
        conv = conv + jnp.dot(emb_k.astype(jnp.bfloat16), w_k,       # lossless cast (bf16 table)
                              preferred_element_type=jnp.float32)
    conv_b = slab_ref[CONV_B_ROW:CONV_B_ROW + 1, :].astype(jnp.float32)   # (1, 128)
    conv = jnp.maximum(conv + conv_b, 0.0)                           # ReLU, f32 (N_TOK, 128)

    # --- per-branch valid-length mask + single max over time -------------------
    t_idx = jax.lax.broadcasted_iota(jnp.int32, (L, CONV_PAD), 0)
    c_idx = jax.lax.broadcasted_iota(jnp.int32, (L, CONV_PAD), 1)
    limit = jnp.full((L, CONV_PAD), L, jnp.int32)
    for i, K in enumerate(KERNEL_SIZES):
        in_branch = (c_idx >= i * F) & (c_idx < (i + 1) * F)
        limit = jnp.where(in_branch, L - K + 1, limit)
    valid = (t_idx < limit)[None]                                    # (1, L, 128)

    conv3 = conv.reshape(BATCH, L, CONV_PAD)                         # L mult. of 8 -> tile-aligned
    conv3 = jnp.where(valid, conv3, 0.0)                             # ReLU >= 0 -> 0-mask exact
    feat = jnp.max(conv3, axis=1)                                    # (B, 128)

    # --- FC (M padded to 8 rows) + masked f32 log_softmax ----------------------
    if OUT_ROWS > BATCH:
        feat = jnp.concatenate(
            [feat, jnp.zeros((OUT_ROWS - BATCH, CONV_PAD), jnp.float32)], axis=0)
    fc_w = slab_ref[FC_W_ROW:FC_W_ROW + CONV_PAD, :]                 # (128, 128) bf16
    fc_b = slab_ref[FC_B_ROW:FC_B_ROW + 1, :].astype(jnp.float32)    # (1, 128)
    logits = jnp.dot(feat.astype(jnp.bfloat16), fc_w,
                     preferred_element_type=jnp.float32) + fc_b      # (8, 128) f32
    cls = jax.lax.broadcasted_iota(jnp.int32, (OUT_ROWS, CONV_PAD), 1)
    logits = jnp.where(cls < NUM_CLASSES, logits, -1e30)             # pad lanes -> -inf-ish (f32)
    m = jnp.max(logits, axis=1, keepdims=True)
    z = logits - m
    lse = jnp.log(jnp.sum(jnp.exp(z), axis=1, keepdims=True))
    out_ref[...] = z - lse                                           # (8, 128) dense store


def init_params(key):
    ks = jax.random.split(key, 2 + 2 * len(KERNEL_SIZES) + 2)
    params = {"embedding": jax.random.normal(ks[0], (VOCAB, EMBED_DIM), jnp.float32)}
    for i, K in enumerate(KERNEL_SIZES):
        params[f"conv{K}_w"] = 0.1 * jax.random.normal(
            ks[1 + 2 * i], (K, EMBED_DIM, NUM_FILTERS), jnp.float32)
        params[f"conv{K}_b"] = 0.1 * jax.random.normal(
            ks[2 + 2 * i], (1, NUM_FILTERS), jnp.float32)
    params["fc_w"] = 0.1 * jax.random.normal(
        ks[-2], (N_FEAT, NUM_CLASSES), jnp.float32)
    params["fc_b"] = 0.1 * jax.random.normal(ks[-1], (1, NUM_CLASSES), jnp.float32)
    return params


def pack_params(params):
    """One-time packing: bf16 embedding table + one bf16 128-lane weight slab."""
    E, F, C = EMBED_DIM, NUM_FILTERS, NUM_CLASSES
    slab = jnp.zeros((SLAB_ROWS, CONV_PAD), jnp.float32)
    for i, K in enumerate(KERNEL_SIZES):
        w = params[f"conv{K}_w"].reshape(K * E, F)       # taps stacked along rows
        slab = slab.at[CONV_W_ROW:CONV_W_ROW + K * E, i * F:(i + 1) * F].set(w)
        slab = slab.at[CONV_B_ROW, i * F:(i + 1) * F].set(params[f"conv{K}_b"][0])
    slab = slab.at[FC_W_ROW:FC_W_ROW + N_FEAT, 0:C].set(params["fc_w"])
    slab = slab.at[FC_B_ROW, 0:C].set(params["fc_b"][0])
    return {"emb": params["embedding"].astype(jnp.bfloat16),
            "slab": slab.astype(jnp.bfloat16)}


@jax.jit
def textcnn_forward(x_tokens, packed):
    # Tiny int glue: per-tap shifted token ids.  Wrapped (r+k)%N_TOK rows only land
    # in time positions that the in-kernel valid-length mask removes before the
    # max-pool, so this stays exact.
    tok = x_tokens.reshape(N_TOK).astype(jnp.int32)
    r = jnp.arange(N_TOK, dtype=jnp.int32)[:, None]
    k = jnp.arange(K_MAX, dtype=jnp.int32)[None, :]
    ids = tok[(r + k) % N_TOK]                           # (N_TOK, K_MAX)

    out = pl.pallas_call(
        textcnn_kernel,
        out_shape=jax.ShapeDtypeStruct((OUT_ROWS, CONV_PAD), jnp.float32),
        grid=(1,),
        in_specs=[
            pl.BlockSpec((N_TOK, K_MAX), lambda i: (0, 0)),
            pl.BlockSpec((VOCAB, EMBED_DIM), lambda i: (0, 0)),
            pl.BlockSpec((SLAB_ROWS, CONV_PAD), lambda i: (0, 0)),
        ],
        out_specs=pl.BlockSpec((OUT_ROWS, CONV_PAD), lambda i: (0, 0)),
        compiler_params=pltpu.CompilerParams(
            dimension_semantics=("arbitrary",),
            vmem_limit_bytes=16 * 1024 * 1024,
        ),
    )(ids, packed["emb"], packed["slab"])
    return out[:BATCH, :NUM_CLASSES]                     # drop padding rows/lanes


def textcnn_reference(x_tokens, params):
    """Pure-JAX f32 reference mirroring the PyTorch forward."""
    emb = params["embedding"][x_tokens].astype(jnp.float32)   # (B, L, E)
    feats = []
    for K in KERNEL_SIZES:
        T = SEQ_LEN - K + 1
        w = params[f"conv{K}_w"]                              # (K, E, F)
        b = params[f"conv{K}_b"][0]                           # (F,)
        acc = jnp.zeros((BATCH, T, NUM_FILTERS), jnp.float32)
        for k in range(K):
            acc = acc + jnp.einsum("bte,ef->btf", emb[:, k:k + T, :], w[k])
        acc = jnp.maximum(acc + b[None, None, :], 0.0)
        feats.append(jnp.max(acc, axis=1))
    feat = jnp.concatenate(feats, axis=1)
    logits = feat @ params["fc_w"] + params["fc_b"][0]
    return jax.nn.log_softmax(logits, axis=1)


if __name__ == "__main__":
    key = jax.random.PRNGKey(0)
    k_tok, k_par = jax.random.split(key)
    x = jax.random.randint(k_tok, (BATCH, SEQ_LEN), 0, VOCAB, dtype=jnp.int32)
    params = init_params(k_par)
    packed = pack_params(params)

    out = textcnn_forward(x, packed)
    out = jax.block_until_ready(out)

    ref = textcnn_reference(x, params)
    assert out.shape == (BATCH, NUM_CLASSES)
    # Tolerance accounts for bf16 MXU operands (params + activations) vs the f32
    # op-by-op reference, plus the restructured (fused) accumulation order.
    assert jnp.allclose(out, ref, atol=5e-2, rtol=5e-2), float(jnp.max(jnp.abs(out - ref)))
    print("KERNEL_OK")
</pallas_src>

<mosaic_0001>
module attributes {stable_mosaic.version = 11 : i64} {
  func.func @textcnn_kernel(%arg0: i32, %arg1: memref<32x5xi32, #tpu.memory_space<vmem>>, %arg2: memref<50x32xbf16, #tpu.memory_space<vmem>>, %arg3: memref<320x128xbf16, #tpu.memory_space<vmem>>, %arg4: memref<8x128xf32, #tpu.memory_space<vmem>>) attributes {dimension_semantics = [#tpu.dimension_semantics<arbitrary>], iteration_bounds = array<i64: 1>, scalar_prefetch = 0 : i64, scratch_operands = 0 : i64, tpu.core_type = #tpu.core_type<tc>, window_params = [{pipeline_mode = #tpu.pipeline_mode<synchronous>, transform_indices = @transform_0, window_bounds = array<i64: 32, 5>}, {pipeline_mode = #tpu.pipeline_mode<synchronous>, transform_indices = @transform_1, window_bounds = array<i64: 50, 32>}, {pipeline_mode = #tpu.pipeline_mode<synchronous>, transform_indices = @transform_2, window_bounds = array<i64: 320, 128>}, {pipeline_mode = #tpu.pipeline_mode<synchronous>, transform_indices = @transform_3, window_bounds = array<i64: 8, 128>}]} {
    %c0 = arith.constant 0 : index
    %c0_0 = arith.constant 0 : index
    %0 = vector.load %arg1[%c0, %c0_0] : memref<32x5xi32, #tpu.memory_space<vmem>>, vector<32x5xi32>
    %c0_1 = arith.constant 0 : index
    %c0_2 = arith.constant 0 : index
    %1 = vector.load %arg2[%c0_1, %c0_2] : memref<50x32xbf16, #tpu.memory_space<vmem>>, vector<50x32xbf16>
    %2 = tpu.iota {dimensions = array<i32: 1>} : vector<32x50xi32>
    %cst = arith.constant 0.000000e+00 : f32
    %3 = vector.broadcast %cst : f32 to vector<32x128xf32>
    %4 = vector.extract_strided_slice %0 {offsets = [0, 0], sizes = [32, 1], strides = [1, 1]} : vector<32x5xi32> to vector<32x1xi32>
    %5 = vector.broadcast %4 : vector<32x1xi32> to vector<32x50xi32>
    %6 = arith.cmpi eq, %5, %2 : vector<32x50xi32>
    %7 = arith.extui %6 : vector<32x50xi1> to vector<32x50xi32>
    %8 = arith.sitofp %7 : vector<32x50xi32> to vector<32x50xf32>
    %9 = arith.truncf %8 : vector<32x50xf32> to vector<32x50xbf16>
    %cst_3 = arith.constant dense<0.000000e+00> : vector<32x32xf32>
    %10 = tpu.matmul %9, %1, %cst_3 {dimension_numbers = #tpu.dot_dimension_numbers<[1], [0], [0], [1], [0, 0, 1, 1], [], []>} : vector<32x50xbf16>, vector<50x32xbf16>, vector<32x32xf32> -> vector<32x32xf32>
    %c0_4 = arith.constant 0 : index
    %c0_5 = arith.constant 0 : index
    %11 = vector.load %arg3[%c0_4, %c0_5] : memref<320x128xbf16, #tpu.memory_space<vmem>>, vector<32x128xbf16>
    %12 = arith.truncf %10 : vector<32x32xf32> to vector<32x32xbf16>
    %cst_6 = arith.constant dense<0.000000e+00> : vector<32x128xf32>
    %13 = tpu.matmul %12, %11, %cst_6 {dimension_numbers = #tpu.dot_dimension_numbers<[1], [0], [0], [1], [0, 0, 1, 1], [], []>} : vector<32x32xbf16>, vector<32x128xbf16>, vector<32x128xf32> -> vector<32x128xf32>
    %14 = arith.addf %3, %13 : vector<32x128xf32>
    %15 = vector.extract_strided_slice %0 {offsets = [0, 1], sizes = [32, 1], strides = [1, 1]} : vector<32x5xi32> to vector<32x1xi32>
    %16 = vector.broadcast %15 : vector<32x1xi32> to vector<32x50xi32>
    %17 = arith.cmpi eq, %16, %2 : vector<32x50xi32>
    %18 = arith.extui %17 : vector<32x50xi1> to vector<32x50xi32>
    %19 = arith.sitofp %18 : vector<32x50xi32> to vector<32x50xf32>
    %20 = arith.truncf %19 : vector<32x50xf32> to vector<32x50xbf16>
    %cst_7 = arith.constant dense<0.000000e+00> : vector<32x32xf32>
    %21 = tpu.matmul %20, %1, %cst_7 {dimension_numbers = #tpu.dot_dimension_numbers<[1], [0], [0], [1], [0, 0, 1, 1], [], []>} : vector<32x50xbf16>, vector<50x32xbf16>, vector<32x32xf32> -> vector<32x32xf32>
    %c32 = arith.constant 32 : index
    %c0_8 = arith.constant 0 : index
    %22 = vector.load %arg3[%c32, %c0_8] : memref<320x128xbf16, #tpu.memory_space<vmem>>, vector<32x128xbf16>
    %23 = arith.truncf %21 : vector<32x32xf32> to vector<32x32xbf16>
    %cst_9 = arith.constant dense<0.000000e+00> : vector<32x128xf32>
    %24 = tpu.matmul %23, %22, %cst_9 {dimension_numbers = #tpu.dot_dimension_numbers<[1], [0], [0], [1], [0, 0, 1, 1], [], []>} : vector<32x32xbf16>, vector<32x128xbf16>, vector<32x128xf32> -> vector<32x128xf32>
    %25 = arith.addf %14, %24 : vector<32x128xf32>
    %26 = vector.extract_strided_slice %0 {offsets = [0, 2], sizes = [32, 1], strides = [1, 1]} : vector<32x5xi32> to vector<32x1xi32>
    %27 = vector.broadcast %26 : vector<32x1xi32> to vector<32x50xi32>
    %28 = arith.cmpi eq, %27, %2 : vector<32x50xi32>
    %29 = arith.extui %28 : vector<32x50xi1> to vector<32x50xi32>
    %30 = arith.sitofp %29 : vector<32x50xi32> to vector<32x50xf32>
    %31 = arith.truncf %30 : vector<32x50xf32> to vector<32x50xbf16>
    %cst_10 = arith.constant dense<0.000000e+00> : vector<32x32xf32>
    %32 = tpu.matmul %31, %1, %cst_10 {dimension_numbers = #tpu.dot_dimension_numbers<[1], [0], [0], [1], [0, 0, 1, 1], [], []>} : vector<32x50xbf16>, vector<50x32xbf16>, vector<32x32xf32> -> vector<32x32xf32>
    %c64 = arith.constant 64 : index
    %c0_11 = arith.constant 0 : index
    %33 = vector.load %arg3[%c64, %c0_11] : memref<320x128xbf16, #tpu.memory_space<vmem>>, vector<32x128xbf16>
    %34 = arith.truncf %32 : vector<32x32xf32> to vector<32x32xbf16>
    %cst_12 = arith.constant dense<0.000000e+00> : vector<32x128xf32>
    %35 = tpu.matmul %34, %33, %cst_12 {dimension_numbers = #tpu.dot_dimension_numbers<[1], [0], [0], [1], [0, 0, 1, 1], [], []>} : vector<32x32xbf16>, vector<32x128xbf16>, vector<32x128xf32> -> vector<32x128xf32>
    %36 = arith.addf %25, %35 : vector<32x128xf32>
    %37 = vector.extract_strided_slice %0 {offsets = [0, 3], sizes = [32, 1], strides = [1, 1]} : vector<32x5xi32> to vector<32x1xi32>
    %38 = vector.broadcast %37 : vector<32x1xi32> to vector<32x50xi32>
    %39 = arith.cmpi eq, %38, %2 : vector<32x50xi32>
    %40 = arith.extui %39 : vector<32x50xi1> to vector<32x50xi32>
    %41 = arith.sitofp %40 : vector<32x50xi32> to vector<32x50xf32>
    %42 = arith.truncf %41 : vector<32x50xf32> to vector<32x50xbf16>
    %cst_13 = arith.constant dense<0.000000e+00> : vector<32x32xf32>
    %43 = tpu.matmul %42, %1, %cst_13 {dimension_numbers = #tpu.dot_dimension_numbers<[1], [0], [0], [1], [0, 0, 1, 1], [], []>} : vector<32x50xbf16>, vector<50x32xbf16>, vector<32x32xf32> -> vector<32x32xf32>
    %c96 = arith.constant 96 : index
    %c0_14 = arith.constant 0 : index
    %44 = vector.load %arg3[%c96, %c0_14] : memref<320x128xbf16, #tpu.memory_space<vmem>>, vector<32x128xbf16>
    %45 = arith.truncf %43 : vector<32x32xf32> to vector<32x32xbf16>
    %cst_15 = arith.constant dense<0.000000e+00> : vector<32x128xf32>
    %46 = tpu.matmul %45, %44, %cst_15 {dimension_numbers = #tpu.dot_dimension_numbers<[1], [0], [0], [1], [0, 0, 1, 1], [], []>} : vector<32x32xbf16>, vector<32x128xbf16>, vector<32x128xf32> -> vector<32x128xf32>
    %47 = arith.addf %36, %46 : vector<32x128xf32>
    %48 = vector.extract_strided_slice %0 {offsets = [0, 4], sizes = [32, 1], strides = [1, 1]} : vector<32x5xi32> to vector<32x1xi32>
    %49 = vector.broadcast %48 : vector<32x1xi32> to vector<32x50xi32>
    %50 = arith.cmpi eq, %49, %2 : vector<32x50xi32>
    %51 = arith.extui %50 : vector<32x50xi1> to vector<32x50xi32>
    %52 = arith.sitofp %51 : vector<32x50xi32> to vector<32x50xf32>
    %53 = arith.truncf %52 : vector<32x50xf32> to vector<32x50xbf16>
    %cst_16 = arith.constant dense<0.000000e+00> : vector<32x32xf32>
    %54 = tpu.matmul %53, %1, %cst_16 {dimension_numbers = #tpu.dot_dimension_numbers<[1], [0], [0], [1], [0, 0, 1, 1], [], []>} : vector<32x50xbf16>, vector<50x32xbf16>, vector<32x32xf32> -> vector<32x32xf32>
    %c128 = arith.constant 128 : index
    %c0_17 = arith.constant 0 : index
    %55 = vector.load %arg3[%c128, %c0_17] : memref<320x128xbf16, #tpu.memory_space<vmem>>, vector<32x128xbf16>
    %56 = arith.truncf %54 : vector<32x32xf32> to vector<32x32xbf16>
    %cst_18 = arith.constant dense<0.000000e+00> : vector<32x128xf32>
    %57 = tpu.matmul %56, %55, %cst_18 {dimension_numbers = #tpu.dot_dimension_numbers<[1], [0], [0], [1], [0, 0, 1, 1], [], []>} : vector<32x32xbf16>, vector<32x128xbf16>, vector<32x128xf32> -> vector<32x128xf32>
    %58 = arith.addf %47, %57 : vector<32x128xf32>
    %c160 = arith.constant 160 : index
    %c0_19 = arith.constant 0 : index
    %59 = vector.load %arg3[%c160, %c0_19] : memref<320x128xbf16, #tpu.memory_space<vmem>>, vector<1x128xbf16>
    %60 = arith.extf %59 : vector<1x128xbf16> to vector<1x128xf32>
    %61 = vector.broadcast %60 : vector<1x128xf32> to vector<32x128xf32>
    %62 = arith.addf %58, %61 : vector<32x128xf32>
    %cst_20 = arith.constant 0.000000e+00 : f32
    %63 = vector.broadcast %cst_20 : f32 to vector<32x128xf32>
    %64 = arith.maximumf %62, %63 : vector<32x128xf32>
    %65 = tpu.iota {dimensions = array<i32: 0>} : vector<16x128xi32>
    %66 = tpu.iota {dimensions = array<i32: 1>} : vector<16x128xi32>
    %c16_i32 = arith.constant 16 : i32
    %67 = vector.broadcast %c16_i32 : i32 to vector<16x128xi32>
    %c0_i32 = arith.constant 0 : i32
    %68 = vector.broadcast %c0_i32 : i32 to vector<16x128xi32>
    %69 = arith.cmpi sge, %66, %68 : vector<16x128xi32>
    %c8_i32 = arith.constant 8 : i32
    %70 = vector.broadcast %c8_i32 : i32 to vector<16x128xi32>
    %71 = arith.cmpi slt, %66, %70 : vector<16x128xi32>
    %72 = arith.andi %69, %71 : vector<16x128xi1>
    %c14_i32 = arith.constant 14 : i32
    %73 = vector.broadcast %c14_i32 : i32 to vector<16x128xi32>
    %74 = arith.select %72, %73, %67 : vector<16x128xi1>, vector<16x128xi32>
    %c8_i32_21 = arith.constant 8 : i32
    %75 = vector.broadcast %c8_i32_21 : i32 to vector<16x128xi32>
    %76 = arith.cmpi sge, %66, %75 : vector<16x128xi32>
    %c16_i32_22 = arith.constant 16 : i32
    %77 = vector.broadcast %c16_i32_22 : i32 to vector<16x128xi32>
    %78 = arith.cmpi slt, %66, %77 : vector<16x128xi32>
    %79 = arith.andi %76, %78 : vector<16x128xi1>
    %c13_i32 = arith.constant 13 : i32
    %80 = vector.broadcast %c13_i32 : i32 to vector<16x128xi32>
    %81 = arith.select %79, %80, %74 : vector<16x128xi1>, vector<16x128xi32>
    %c16_i32_23 = arith.constant 16 : i32
    %82 = vector.broadcast %c16_i32_23 : i32 to vector<16x128xi32>
    %83 = arith.cmpi sge, %66, %82 : vector<16x128xi32>
    %c24_i32 = arith.constant 24 : i32
    %84 = vector.broadcast %c24_i32 : i32 to vector<16x128xi32>
    %85 = arith.cmpi slt, %66, %84 : vector<16x128xi32>
    %86 = arith.andi %83, %85 : vector<16x128xi1>
    %c12_i32 = arith.constant 12 : i32
    %87 = vector.broadcast %c12_i32 : i32 to vector<16x128xi32>
    %88 = arith.select %86, %87, %81 : vector<16x128xi1>, vector<16x128xi32>
    %89 = arith.cmpi slt, %65, %88 : vector<16x128xi32>
    %90 = vector.shape_cast %89 : vector<16x128xi1> to vector<1x16x128xi1>
    %91 = vector.shape_cast %64 : vector<32x128xf32> to vector<2x16x128xf32>
    %cst_24 = arith.constant 0.000000e+00 : f32
    %92 = vector.shape_cast %90 : vector<1x16x128xi1> to vector<1x16x128xi1>
    %93 = vector.broadcast %92 : vector<1x16x128xi1> to vector<2x16x128xi1>
    %94 = vector.broadcast %cst_24 : f32 to vector<2x16x128xf32>
    %95 = arith.select %93, %91, %94 : vector<2x16x128xi1>, vector<2x16x128xf32>
    %cst_25 = arith.constant dense<0xFF800000> : vector<2x128xf32>
    %96 = vector.multi_reduction <maximumf>, %95, %cst_25 [1] : vector<2x16x128xf32> to vector<2x128xf32>
    %cst_26 = arith.constant 0.000000e+00 : f32
    %97 = vector.broadcast %cst_26 : f32 to vector<6x128xf32>
    %98 = tpu.concatenate %96, %97 in 0 : vector<2x128xf32>, vector<6x128xf32> -> vector<8x128xf32>
    %c176 = arith.constant 176 : index
    %c0_27 = arith.constant 0 : index
    %99 = vector.load %arg3[%c176, %c0_27] : memref<320x128xbf16, #tpu.memory_space<vmem>>, vector<128x128xbf16>
    %c304 = arith.constant 304 : index
    %c0_28 = arith.constant 0 : index
    %100 = vector.load %arg3[%c304, %c0_28] : memref<320x128xbf16, #tpu.memory_space<vmem>>, vector<1x128xbf16>
    %101 = arith.extf %100 : vector<1x128xbf16> to vector<1x128xf32>
    %102 = arith.truncf %98 : vector<8x128xf32> to vector<8x128xbf16>
    %cst_29 = arith.constant dense<0.000000e+00> : vector<8x128xf32>
    %103 = tpu.matmul %102, %99, %cst_29 {dimension_numbers = #tpu.dot_dimension_numbers<[1], [0], [0], [1], [0, 0, 1, 1], [], []>} : vector<8x128xbf16>, vector<128x128xbf16>, vector<8x128xf32> -> vector<8x128xf32>
    %104 = vector.broadcast %101 : vector<1x128xf32> to vector<8x128xf32>
    %105 = arith.addf %103, %104 : vector<8x128xf32>
    %106 = tpu.iota {dimensions = array<i32: 1>} : vector<8x128xi32>
    %c4_i32 = arith.constant 4 : i32
    %107 = vector.broadcast %c4_i32 : i32 to vector<8x128xi32>
    %108 = arith.cmpi slt, %106, %107 : vector<8x128xi32>
    %cst_30 = arith.constant -1.000000e+30 : f32
    %109 = vector.broadcast %cst_30 : f32 to vector<8x128xf32>
    %110 = arith.select %108, %105, %109 : vector<8x128xi1>, vector<8x128xf32>
    %cst_31 = arith.constant dense<0xFF800000> : vector<8xf32>
    %111 = vector.multi_reduction <maximumf>, %110, %cst_31 [1] : vector<8x128xf32> to vector<8xf32>
    %112 = vector.shape_cast %111 : vector<8xf32> to vector<8x1xf32>
    %113 = vector.broadcast %112 : vector<8x1xf32> to vector<8x128xf32>
    %114 = arith.subf %110, %113 : vector<8x128xf32>
    %115 = math.exp %114 : vector<8x128xf32>
    %cst_32 = arith.constant dense<0.000000e+00> : vector<8xf32>
    %116 = vector.multi_reduction <add>, %115, %cst_32 [1] : vector<8x128xf32> to vector<8xf32>
    %117 = vector.shape_cast %116 : vector<8xf32> to vector<8x1xf32>
    %118 = math.log %117 : vector<8x1xf32>
    %119 = vector.broadcast %118 : vector<8x1xf32> to vector<8x128xf32>
    %120 = arith.subf %114, %119 : vector<8x128xf32>
    %c0_33 = arith.constant 0 : index
    %c0_34 = arith.constant 0 : index
    %121 = vector.load %arg4[%c0_33, %c0_34] : memref<8x128xf32, #tpu.memory_space<vmem>>, vector<8x128xf32>
    tpu.vector_store %arg4[%c0_33, %c0_34], %120 {strides = array<i32>} : memref<8x128xf32, #tpu.memory_space<vmem>>, vector<8x128xf32>,
    return
  }
  func.func @transform_0(%arg0: i32) -> (i32, i32) {
    %c0_i32 = arith.constant 0 : i32
    %c0_i32_0 = arith.constant 0 : i32
    %c0_i32_1 = arith.constant 0 : i32
    return %c0_i32, %c0_i32_0 : i32, i32
  }
  func.func @transform_1(%arg0: i32) -> (i32, i32) {
    %c0_i32 = arith.constant 0 : i32
    %c0_i32_0 = arith.constant 0 : i32
    %c0_i32_1 = arith.constant 0 : i32
    return %c0_i32, %c0_i32_0 : i32, i32
  }
  func.func @transform_2(%arg0: i32) -> (i32, i32) {
    %c0_i32 = arith.constant 0 : i32
    %c0_i32_0 = arith.constant 0 : i32
    %c0_i32_1 = arith.constant 0 : i32
    return %c0_i32, %c0_i32_0 : i32, i32
  }
  func.func @transform_3(%arg0: i32) -> (i32, i32) {
    %c0_i32 = arith.constant 0 : i32
    %c0_i32_0 = arith.constant 0 : i32
    %c0_i32_1 = arith.constant 0 : i32
    return %c0_i32, %c0_i32_0 : i32, i32
  }
}

</mosaic_0001>

<bundles_post_ra>
// kernel: textcnn_forward.1
= control target key start
LH: loop header
LB: loop body
LE: loop exit
PB: predicated region body
PF: predicated region fallthrough
CT: control target
= control target key end

     0   :  { %v1334_v0 = vmov 1   ;;  %v1335_v8 = vmov 0   ;;  %vm82_vm0 = vcmask 1040384   ;;  %v1336_v11 = vmov 2   ;;  %s1585_s0 = inlined_call_operand.vmem [shape: s32[32,5], index: 0, kind: input, shape index: {}]   ;;  %s1586_s1 = inlined_call_operand.vmem [shape: bf16[50,32], index: 1, kind: input, shape index: {}]   ;;  %s1587_s2 = inlined_call_operand.vmem [shape: bf16[320,128], index: 2, kind: input, shape index: {}]   ;;  %s1588_s3 = inlined_call_operand.vmem [shape: f32[8,128], index: 3, kind: output, shape index: {}]  }
   0x1   :  { %1299 = vset.pattern.permute.xlu1 %v1334_v0  ;;  %1298 = vset.pattern.permute.xlu0 %v1334_v0  ;;  %v17_v1 = vld [vmem:[%s1585_s0 + $0x10] sm:$0xff]  ;;  %v15_v2 = vld [vmem:[%s1585_s0] sm:$0xff]  ;;  %v18_v3 = vld [vmem:[%s1585_s0 + $0x18] sm:$0xff]  ;;  %v1337_v12 = vmov 3   ;;  %v1338_v13 = vmov 4   ;;  %v26_v15 = vlaneseq  ;;  %vm75_vm5 = vcmask 408576  }
   0x2   :  { %148 = vperm.xlu1 %1299, %v17_v1   ;;  %142 = vperm.xlu0 %1298, %v15_v2   ;;  %v16_v4 = vld [vmem:[%s1585_s0 + $0x8] sm:$0xff]  ;;  %v1377_v5 = vld [vmem:[%s1586_s1] sm:$0xff]   ;;  %v1393_v7 = vld [vmem:[%s1586_s1 + $0x10] sm:$0xff]   ;;  %v1339_v21 = vmov 0.0  }
   0x3   :  { %v1382_v6 = vld [vmem:[%s1586_s1 + $0x8] sm:$0xff]   ;;  %1161 = vmatprep.subr.bf16.mxu1 %v1377_v5  ;;  %1149 = vmatprep.subr.bf16.mxu0 %v1377_v5  ;;  %v1401_v9 = vld [vmem:[%s1586_s1 + $0x18] ss:$0 sps:$4 sm:$0x11]   ;;  %v1312_v14 = vld [vmem:[%s1587_s2 + $0x10] sm:$0xff]   ;;  %v1421_v16 = vand.u32 127, %v26_v15 }
   0x4   :  { %1162 = vmatpush3.bf16.msra.mxu1 %v1377_v5  ;;  %1150 = vmatpush3.bf16.msra.mxu0 %v1377_v5  ;;  %v1412_v10 = vsel %vm82_vm0, %v1401_v9, 0  ;;  %v1313_v58 = vld [vmem:[%s1587_s2 + $0x18] sm:$0xff]   ;;  %v1314_v59 = vld [vmem:[%s1587_s2] sm:$0xff]  }
   0x5   :  { %1163 = vmatprep.subr.bf16.mxu1 %v1382_v6  ;;  %1151 = vmatprep.subr.bf16.mxu0 %v1382_v6 }
   0x6   :  { %151 = vperm.xlu1 %1299, %v18_v3   ;;  %145 = vperm.xlu0 %1298, %v16_v4  }
   0x8   :  { %1164 = vmatpush3.bf16.msra.mxu1 %v1382_v6  ;;  %1152 = vmatpush3.bf16.msra.mxu0 %v1382_v6 }
   0x9   :  { %1165 = vmatprep.subr.bf16.mxu1 %v1393_v7  ;;  %1153 = vmatprep.subr.bf16.mxu0 %v1393_v7 }
   0xa   :  { %1301 = vset.pattern.permute.xlu1 %v1335_v8  ;;  %1300 = vset.pattern.permute.xlu0 %v1335_v8  ;;  %v1316_v8 = vld [vmem:[%s1587_s2 + $0x20] sm:$0xff]  }
   0xb   :  { %32 = vperm.xlu1 %1301, %v16_v4   ;;  %29 = vperm.xlu0 %1300, %v15_v2  }
   0xc   :  { %1166 = vmatpush3.bf16.msra.mxu1 %v1393_v7  ;;  %1154 = vmatpush3.bf16.msra.mxu0 %v1393_v7 }
   0xd   :  { %1286 = vmatprep.subr.msk.bf16.mxu1 %vm82_vm0, %v1401_v9  ;;  %1285 = vmatprep.subr.msk.bf16.mxu0 %vm82_vm0, %v1401_v9 }
   0xf   :  { %35 = vperm.xlu1 %1301, %v17_v1   ;;  %38 = vperm.xlu0 %1300, %v18_v3  }
  0x10   :  { %1168 = vmatpush3.bf16.msra.mxu1 %v1412_v10  ;;  %1156 = vmatpush3.bf16.msra.mxu0 %v1412_v10 }
  0x11   :  { %1189 = vmatprep.subr.bf16.mxu1 %v1377_v5  ;;  %1173 = vmatprep.subr.bf16.mxu0 %v1312_v14 }
  0x13   :  { %1302 = vset.pattern.permute.xlu1 %v1336_v11  ;;  %1303 = vset.pattern.permute.xlu0 %v1336_v11 }
  0x14   :  { %364 = vperm.xlu1 %1302, %v15_v2   ;;  %367 = vperm.xlu0 %1303, %v16_v4  }
  0x18   :  { %370 = vperm.xlu1 %1302, %v17_v1   ;;  %1304 = vset.pattern.permute.xlu0 %v1337_v12 }
  0x19   :  { %522 = vperm.xlu0 %1304, %v15_v2  }
  0x1c   :  { %373 = vperm.xlu1 %1302, %v18_v3  }
  0x1d   :  { %531 = vperm.xlu0 %1304, %v18_v3  }
  0x20   :  { %1305 = vset.pattern.permute.xlu1 %v1337_v12 }
  0x21   :  { %525 = vperm.xlu1 %1305, %v16_v4   ;;  %1307 = vset.pattern.permute.xlu0 %v1338_v13 }
  0x22   :  { %683 = vperm.xlu0 %1307, %v16_v4  }
  0x25   :  { %528 = vperm.xlu1 %1305, %v17_v1  }
  0x29   :  { %1306 = vset.pattern.permute.xlu1 %v1338_v13 }
  0x2a   :  { %680 = vperm.xlu1 %1306, %v15_v2   ;;  %v1315_v2 = vld [vmem:[%s1587_s2 + $0x8] sm:$0xff]  }
  0x2e   :  { %686 = vperm.xlu1 %1306, %v17_v1  }
  0x32   :  { %689 = vperm.xlu1 %1306, %v18_v3  }
  0x81   :  { %v149_v17 = vpop.permute.xlu1 %148  ;;  %v143_v18 = vpop.permute.xlu0 %142 }
  0x82   :  { %vm155_vm1 = vcmp.eq.s32.totalorder %v149_v17, %v1421_v16  ;;  %vm153_vm2 = vcmp.eq.s32.totalorder %v143_v18, %v1421_v16  ;;  %v1317_v17 = vld [vmem:[%s1587_s2 + $0x28] sm:$0xff]  }
  0x83   :  { %v1037_v22 = vsel %vm155_vm1, 1.0, %v1339_v21  ;;  %v1035_v23 = vsel %vm153_vm2, 1.0, %v1339_v21 }
  0x85   :  { %v152_v19 = vpop.permute.xlu1 %151  ;;  %v146_v20 = vpop.permute.xlu0 %145 }
  0x86   :  { %vm156_vm3 = vcmp.eq.s32.totalorder %v152_v19, %v1421_v16  ;;  %vm154_vm4 = vcmp.eq.s32.totalorder %v146_v20, %v1421_v16  ;;  %v1318_v19 = vld [vmem:[%s1587_s2 + $0x30] sm:$0xff]  }
  0x87   :  { %v1038_v24 = vsel %vm156_vm3, 1.0, %v1339_v21  ;;  %v1036_v25 = vsel %vm154_vm4, 1.0, %v1339_v21  ;;  %vm240_vm3 = vcmask 261120  }
  0x88   :  { %v166_v26 = vpack.c.bf16 %v1038_v24, %v1037_v22  ;;  %v165_v27 = vpack.c.bf16 %v1036_v25, %v1035_v23 }
  0x8a   :  { %v33_v28 = vpop.permute.xlu1 %32  ;;  %1169 = vmatprep.mubr.msk.bf16.mxu1 %vm75_vm5, %v165_v27  ;;  %v30_v29 = vpop.permute.xlu0 %29 }
  0x8b   :  { %vm41_vm6 = vcmp.eq.s32.totalorder %v33_v28, %v1421_v16  ;;  %vm40_vm7 = vcmp.eq.s32.totalorder %v30_v29, %v1421_v16  ;;  %1170 = vmatmul.mubr.msk.bf16.vlgmr.msra.gmra.mrb[0].mxu1 %vm75_vm5, %v166_v26  ;;  %v1319_v26 = vld [vmem:[%s1587_s2 + $0x38] sm:$0xff]  }
  0x8c   :  { %v1026_v30 = vsel %vm41_vm6, 1.0, %v1339_v21  ;;  %v1025_v31 = vsel %vm40_vm7, 1.0, %v1339_v21  ;;  %1190 = vmatpush3.bf16.msra.mxu1 %v1377_v5 }
  0x8d   :  { %v52_v32 = vpack.c.bf16 %v1026_v30, %v1025_v31  ;;  %1191 = vmatprep.subr.bf16.mxu1 %v1382_v6 }
  0x8e   :  { %v36_v33 = vpop.permute.xlu1 %35  ;;  %v39_v34 = vpop.permute.xlu0 %38 }
  0x8f   :  { %vm42_vm8 = vcmp.eq.s32.totalorder %v36_v33, %v1421_v16  ;;  %vm43_vm9 = vcmp.eq.s32.totalorder %v39_v34, %v1421_v16  ;;  %1157 = vmatprep.mubr.msk.bf16.mxu0 %vm75_vm5, %v52_v32 }
  0x90   :  { %v1027_v35 = vsel %vm42_vm8, 1.0, %v1339_v21  ;;  %v1028_v36 = vsel %vm43_vm9, 1.0, %v1339_v21  ;;  %1192 = vmatpush3.bf16.msra.mxu1 %v1382_v6  ;;  %vm858_vm9 = vcmp.ge.s32.totalorder %v1421_v16, 8 }
  0x91   :  { %v53_v37 = vpack.c.bf16 %v1028_v36, %v1027_v35  ;;  %1193 = vmatprep.subr.bf16.mxu1 %v1393_v7 }
  0x93   :  { %v365_v38 = vpop.permute.xlu1 %364  ;;  %1158 = vmatmul.mubr.msk.bf16.vlgmr.msra.gmra.mrb[0].mxu0 %vm75_vm5, %v53_v37  ;;  %v368_v39 = vpop.permute.xlu0 %367 }
  0x94   :  { %vm375_vm10 = vcmp.eq.s32.totalorder %v365_v38, %v1421_v16  ;;  %vm376_vm11 = vcmp.eq.s32.totalorder %v368_v39, %v1421_v16  ;;  %1194 = vmatpush3.bf16.msra.mxu1 %v1393_v7  ;;  %1174 = vmatpush3.bf16.msra.mxu0 %v1312_v14 }
  0x95   :  { %v1049_v40 = vsel %vm375_vm10, 1.0, %v1339_v21  ;;  %v1050_v41 = vsel %vm376_vm11, 1.0, %v1339_v21  ;;  %1287 = vmatprep.subr.msk.bf16.mxu1 %vm82_vm0, %v1401_v9  ;;  %1175 = vmatprep.subr.bf16.mxu0 %v1313_v58  ;;  %vm859_vm10 = vcmp.lt.s32.totalorder %v1421_v16, 16 }
  0x96   :  { %v387_v42 = vpack.c.bf16 %v1050_v41, %v1049_v40  ;;  %vm860_vm11 = vmand %vm858_vm9, %vm859_vm10 }
  0x97   :  { %v371_v43 = vpop.permute.xlu1 %370 }
  0x98   :  { %1197 = vmatprep.mubr.msk.bf16.mxu1 %vm75_vm5, %v387_v42  ;;  %1196 = vmatpush3.bf16.msra.mxu1 %v1412_v10  ;;  %vm377_vm12 = vcmp.eq.s32.totalorder %v371_v43, %v1421_v16  ;;  %v523_v45 = vpop.permute.xlu0 %522 }
  0x99   :  { %1209 = vmatprep.subr.bf16.mxu1 %v1377_v5  ;;  %v1051_v46 = vsel %vm377_vm12, 1.0, %v1339_v21  ;;  %vm533_vm14 = vcmp.eq.s32.totalorder %v523_v45, %v1421_v16  ;;  %1176 = vmatpush3.bf16.msra.mxu0 %v1313_v58  ;;  %v1341_v58 = vmov 16   ;;  %vm862_vm12 = vcmp.ge.s32.totalorder %v1421_v16, 16 }
  0x9a   :  { %v1059_v50 = vsel %vm533_vm14, 1.0, %v1339_v21  ;;  %1181 = vmatprep.subr.bf16.mxu0 %v1314_v59 }
  0x9b   :  { %v374_v44 = vpop.permute.xlu1 %373 }
  0x9c   :  { %vm378_vm13 = vcmp.eq.s32.totalorder %v374_v44, %v1421_v16  ;;  %v532_v54 = vpop.permute.xlu0 %531 }
  0x9d   :  { %v1052_v47 = vsel %vm378_vm13, 1.0, %v1339_v21  ;;  %vm536_vm2 = vcmp.eq.s32.totalorder %v532_v54, %v1421_v16  ;;  %v840_v54 = vshrl.u32 %v26_v15, 7  ;;  %vm863_vm13 = vcmp.lt.s32.totalorder %v1421_v16, 24 }
  0x9e   :  { %v388_v48 = vpack.c.bf16 %v1052_v47, %v1051_v46  ;;  %v1062_v56 = vsel %vm536_vm2, 1.0, %v1339_v21  ;;  %vm864_vm14 = vmand %vm862_vm12, %vm863_vm13  ;;  %vm892_vm2 = vcmask 1041409  }
  0xa0   :  { %1198 = vmatmul.mubr.msk.bf16.vlgmr.msra.gmra.mrb[4].mxu1 %vm75_vm5, %v388_v48  ;;  %v526_v49 = vpop.permute.xlu1 %525  ;;  %v1324_v48 = vld [vmem:[%s1587_s2 + $0x68] sm:$0xff]  }
  0xa1   :  { %1210 = vmatpush3.bf16.msra.mxu1 %v1377_v5  ;;  %vm534_vm15 = vcmp.eq.s32.totalorder %v526_v49, %v1421_v16  ;;  %v684_v27 = vpop.permute.xlu0 %683  ;;  %v1325_v49 = vld [vmem:[%s1587_s2 + $0x70] sm:$0xff]  }
  0xa2   :  { %v1060_v51 = vsel %vm534_vm15, 1.0, %v1339_v21  ;;  %1211 = vmatprep.subr.bf16.mxu1 %v1382_v6  ;;  %vm692_vm6 = vcmp.eq.s32.totalorder %v684_v27, %v1421_v16 }
  0xa3   :  { %v545_v52 = vpack.c.bf16 %v1060_v51, %v1059_v50  ;;  %v1070_v32 = vsel %vm692_vm6, 1.0, %v1339_v21  ;;  %v1326_v50 = vld [vmem:[%s1587_s2 + $0x78] sm:$0xff]   ;;  %v1327_v51 = vld [vmem:[%s1587_s2 + $0x80] sm:$0xff]   ;;  %vm1008_vm6 = vcmp.lt.s32.totalorder %v1421_v16, 4 }
  0xa4   :  { %v529_v53 = vpop.permute.xlu1 %528 }
  0xa5   :  { %1212 = vmatpush3.bf16.msra.mxu1 %v1382_v6  ;;  %1217 = vmatprep.mubr.msk.bf16.mxu1 %vm75_vm5, %v545_v52  ;;  %vm535_vm1 = vcmp.eq.s32.totalorder %v529_v53, %v1421_v16  ;;  %v1328_v52 = vld [vmem:[%s1587_s2 + $0x88] sm:$0xff]   ;;  %v1329_v53 = vld [vmem:[%s1587_s2 + $0x90] sm:$0xff]  }
  0xa6   :  { %1213 = vmatprep.subr.bf16.mxu1 %v1393_v7  ;;  %v1061_v55 = vsel %vm535_vm1, 1.0, %v1339_v21 }
  0xa7   :  { %v546_v57 = vpack.c.bf16 %v1062_v56, %v1061_v55  ;;  %v837_v55 = vld [vmem:[%s1587_s2 + $0x50] sm:$0x1] }
  0xa8   :  { %v838_v56 = vunpack.c.l.bf16 %v837_v55 }
  0xa9   :  { %1214 = vmatpush3.bf16.msra.mxu1 %v1393_v7  ;;  %v681_v28 = vpop.permute.xlu1 %680 }
  0xaa   :  { %1288 = vmatprep.subr.msk.bf16.mxu1 %vm82_vm0, %v1401_v9  ;;  %vm691_vm4 = vcmp.eq.s32.totalorder %v681_v28, %v1421_v16 }
  0xab   :  { %v1069_v30 = vsel %vm691_vm4, 1.0, %v1339_v21 }
  0xac   :  { %v703_v37 = vpack.c.bf16 %v1070_v32, %v1069_v30 }
  0xad   :  { %1216 = vmatpush3.bf16.msra.mxu1 %v1412_v10  ;;  %v687_v38 = vpop.permute.xlu1 %686 }
  0xae   :  { %1249 = vmatprep.subr.bf16.mxu1 %v1339_v21  ;;  %vm693_vm7 = vcmp.eq.s32.totalorder %v687_v38, %v1421_v16  ;;  %v913_v38 = vld [vmem:[%s1587_s2 + $0x98] sm:$0x1] }
  0xaf   :  { %v1071_v40 = vsel %vm693_vm7, 1.0, %v1339_v21 }
  0xb0   :  { %1218 = vmatmul.mubr.msk.bf16.vlgmr.msra.gmra.mrb[8].mxu1 %vm75_vm5, %v546_v57  ;;  %v841_v57 = vsub.s32 0, %v840_v54 }
  0xb1   :  { %v690_v39 = vpop.permute.xlu1 %689 }
  0xb2   :  { %vm694_vm8 = vcmp.eq.s32.totalorder %v690_v39, %v1421_v16  ;;  %v842_v15 = vrot.slane %v838_v56, %v841_v57  ;;  %v914_v39 = vunpack.c.l.bf16 %v913_v38 }
  0xb3   :  { %v1072_v41 = vsel %vm694_vm8, 1.0, %v1339_v21 }
 0x15e   :  { %v1171_v60 = vpop.f32.mrb[0].mxu1 }
 0x15f   :  { %v207_v61 = vpop.f32.mrb[1].mxu1 }
 0x160   :  { %v1172_v62 = vpop.f32.mrb[2].mxu1 }
 0x161   :  { %v227_v63 = vpack.c.bf16 %v1172_v62, %v1171_v60  ;;  %v210_v0 = vpop.f32.mrb[3].mxu1 }
 0x162   :  { %v226_v1 = vpack.c.bf16 %v210_v0, %v207_v61  ;;  %v853_v61 = vadd.s32 8, %v840_v54 }
 0x164   :  { %1177 = vmatprep.mubr.msk.bf16.mxu0 %vm240_vm3, %v226_v1 }
 0x165   :  { %1178 = vmatmul.mubr.msk.bf16.vlgmr.msra.gmra.mrb[4].mxu0 %vm240_vm3, %v227_v63 }
 0x166   :  { %1182 = vmatpush3.bf16.msra.mxu0 %v1314_v59  ;;  %v1159_v3 = vpop.f32.mrb[0].mxu0 }
 0x167   :  { %v120_v4 = vpop.f32.mrb[1].mxu0  ;;  %1183 = vmatprep.subr.bf16.mxu0 %v1315_v2 }
 0x168   :  { %v1160_v11 = vpop.f32.mrb[2].mxu0 }
 0x169   :  { %v140_v12 = vpack.c.bf16 %v1160_v11, %v1159_v3  ;;  %v123_v13 = vpop.f32.mrb[3].mxu0 }
 0x16a   :  { %v139_v14 = vpack.c.bf16 %v123_v13, %v120_v4  ;;  %1184 = vmatpush3.bf16.msra.mxu0 %v1315_v2 }
 0x16b   :  { %1201 = vmatprep.subr.bf16.mxu0 %v1316_v8 }
 0x16c   :  { %1185 = vmatprep.mubr.msk.bf16.mxu0 %vm240_vm3, %v139_v14 }
 0x171   :  { %1186 = vmatmul.mubr.msk.bf16.vlgmr.msra.gmra.mrb[4].mxu0 %vm240_vm3, %v140_v12 }
 0x172   :  { %1202 = vmatpush3.bf16.msra.mxu0 %v1316_v8 }
 0x173   :  { %v1199_v18 = vpop.f32.mrb[4].mxu1  ;;  %1203 = vmatprep.subr.bf16.mxu0 %v1317_v17 }
 0x174   :  { %v429_v20 = vpop.f32.mrb[5].mxu1 }
 0x175   :  { %v1200_v22 = vpop.f32.mrb[6].mxu1 }
 0x176   :  { %v449_v23 = vpack.c.bf16 %v1200_v22, %v1199_v18  ;;  %v432_v24 = vpop.f32.mrb[7].mxu1  ;;  %1204 = vmatpush3.bf16.msra.mxu0 %v1317_v17 }
 0x177   :  { %v448_v25 = vpack.c.bf16 %v432_v24, %v429_v20  ;;  %1221 = vmatprep.subr.bf16.mxu0 %v1318_v19 }
 0x179   :  { %1205 = vmatprep.mubr.msk.bf16.mxu0 %vm240_vm3, %v448_v25 }
 0x17d   :  { %1206 = vmatmul.mubr.msk.bf16.vlgmr.msra.gmra.mrb[4].mxu0 %vm240_vm3, %v449_v23 }
 0x17e   :  { %1222 = vmatpush3.bf16.msra.mxu0 %v1318_v19 }
 0x17f   :  { %1223 = vmatprep.subr.bf16.mxu0 %v1319_v26 }
 0x182   :  { %1224 = vmatpush3.bf16.msra.mxu0 %v1319_v26 }
 0x183   :  { %v1219_v29 = vpop.f32.mrb[8].mxu1  ;;  %1229 = vmatprep.subr.bf16.mxu0 %v1377_v5 }
 0x184   :  { %v587_v31 = vpop.f32.mrb[9].mxu1 }
 0x185   :  { %v1220_v33 = vpop.f32.mrb[10].mxu1 }
 0x186   :  { %v607_v34 = vpack.c.bf16 %v1220_v33, %v1219_v29  ;;  %v590_v35 = vpop.f32.mrb[11].mxu1 }
 0x187   :  { %v606_v36 = vpack.c.bf16 %v590_v35, %v587_v31 }
 0x189   :  { %1225 = vmatprep.mubr.msk.bf16.mxu0 %vm240_vm3, %v606_v36 }
 0x18a   :  { %1226 = vmatmul.mubr.msk.bf16.vlgmr.msra.gmra.mrb[4].mxu0 %vm240_vm3, %v607_v34 }
 0x18b   :  { %1230 = vmatpush3.bf16.msra.mxu0 %v1377_v5  ;;  %1237 = vmatprep.mubr.msk.bf16.mxu0 %vm75_vm5, %v703_v37  ;;  %v1320_v5 = vld [vmem:[%s1587_s2 + $0x40] sm:$0xff]  }
 0x18c   :  { %1231 = vmatprep.subr.bf16.mxu0 %v1382_v6 }
 0x18f   :  { %1232 = vmatpush3.bf16.msra.mxu0 %v1382_v6  ;;  %v704_v6 = vpack.c.bf16 %v1072_v41, %v1071_v40 }
 0x190   :  { %1233 = vmatprep.subr.bf16.mxu0 %v1393_v7 }
 0x193   :  { %1234 = vmatpush3.bf16.msra.mxu0 %v1393_v7  ;;  %v1321_v7 = vld [vmem:[%s1587_s2 + $0x48] sm:$0xff]  }
 0x194   :  { %1289 = vmatprep.subr.msk.bf16.mxu0 %vm82_vm0, %v1401_v9  ;;  %v1322_v9 = vld [vmem:[%s1587_s2 + $0x58] sm:$0xff]   ;;  %vm1340_vm0 = vmmov 0  }
 0x195   :  { %1250 = vmatpush3.bf16.msra.mxu1 %v1322_v9  ;;  %1265 = vmatprep.mubr.msk.bf16.mxu1 %vm1340_vm0, %v1339_v21 }
 0x196   :  { %1251 = vmatprep.subr.bf16.mxu1 %v1339_v21 }
 0x197   :  { %1236 = vmatpush3.bf16.msra.mxu0 %v1412_v10  ;;  %v1323_v10 = vld [vmem:[%s1587_s2 + $0x60] sm:$0xff]  }
 0x198   :  { %1241 = vmatprep.subr.bf16.mxu0 %v1320_v5 }
 0x199   :  { %1252 = vmatpush3.bf16.msra.mxu1 %v1323_v10 }
 0x19a   :  { %1238 = vmatmul.mubr.msk.bf16.vlgmr.msra.gmra.mrb[8].mxu0 %vm75_vm5, %v704_v6  ;;  %1253 = vmatprep.subr.bf16.mxu1 %v1339_v21  ;;  %vm855_vm5 = vcmp.lt.s32.totalorder %v1421_v16, 8 }
 0x19b   :  { %1242 = vmatpush3.bf16.msra.mxu0 %v1320_v5  ;;  %v857_v59 = vsel %vm855_vm5, 14, %v1341_v58  ;;  %v919_v5 = vrot.slane %v914_v39, %v841_v57 }
 0x19c   :  { %1243 = vmatprep.subr.bf16.mxu0 %v1321_v7 }
 0x19d   :  { %1254 = vmatpush3.bf16.msra.mxu1 %v1324_v48 }
 0x19e   :  { %1255 = vmatprep.subr.bf16.mxu1 %v1339_v21 }
 0x19f   :  { %1244 = vmatpush3.bf16.msra.mxu0 %v1321_v7 }
 0x1a1   :  { %1256 = vmatpush3.bf16.msra.mxu1 %v1325_v49 }
 0x1a2   :  { %1257 = vmatprep.subr.bf16.mxu1 %v1339_v21 }
 0x1a5   :  { %1258 = vmatpush3.bf16.msra.mxu1 %v1326_v50 }
 0x1a6   :  { %1259 = vmatprep.subr.bf16.mxu1 %v1339_v21 }
 0x1a9   :  { %1260 = vmatpush3.bf16.msra.mxu1 %v1327_v51 }
 0x1aa   :  { %1261 = vmatprep.subr.bf16.mxu1 %v1339_v21 }
 0x1ad   :  { %1262 = vmatpush3.bf16.msra.mxu1 %v1328_v52 }
 0x1ae   :  { %1263 = vmatprep.subr.bf16.mxu1 %v1339_v21  ;;  %v861_v21 = vsel %vm860_vm11, 13, %v857_v59 }
 0x1af   :  { %v865_v63 = vsel %vm864_vm14, 12, %v861_v21 }
 0x1b0   :  { %vm866_vm15 = vcmp.lt.s32.totalorder %v840_v54, %v865_v63  ;;  %vm867_vm1 = vcmp.lt.s32.totalorder %v853_v61, %v865_v63 }
 0x1b1   :  { %1264 = vmatpush3.bf16.msra.mxu1 %v1329_v53 }
 0x26d   :  { %v1239_v42 = vpop.f32.mrb[8].mxu0 }
 0x26e   :  { %v745_v43 = vpop.f32.mrb[9].mxu0 }
 0x26f   :  { %v1240_v44 = vpop.f32.mrb[10].mxu0 }
 0x270   :  { %v765_v45 = vpack.c.bf16 %v1240_v44, %v1239_v42  ;;  %v748_v46 = vpop.f32.mrb[11].mxu0 }
 0x271   :  { %v764_v47 = vpack.c.bf16 %v748_v46, %v745_v43 }
 0x273   :  { %1245 = vmatprep.mubr.msk.bf16.mxu0 %vm240_vm3, %v764_v47 }
 0x274   :  { %1246 = vmatmul.mubr.msk.bf16.vlgmr.msra.gmra.mrb[4].mxu0 %vm240_vm3, %v765_v45  ;;  %vm895_vm3 = vcmask 1041408  }
 0x275   :  { %vm1087_vm4 = vmpackc.low %vm895_vm3, %vm895_vm3 }
 0x347   :  { %v1247_v60 = vpop.f32.mrb[4].mxu0 }
 0x348   :  { %v845_v62 = vadd.f32 %v1247_v60, %v842_v15  ;;  %v818_v0 = vpop.f32.mrb[5].mxu0 }
 0x349   :  { %v843_v1 = vadd.f32 %v842_v15, %v818_v0  ;;  %v1248_v2 = vpop.f32.mrb[6].mxu0 }
 0x34a   :  { %v849_v3 = vmax.f32 %v845_v62, 0.0  ;;  %v846_v4 = vadd.f32 %v1248_v2, %v842_v15  ;;  %v821_v8 = vpop.f32.mrb[7].mxu0 }
 0x34b   :  { %v847_v11 = vmax.f32 %v843_v1, 0.0  ;;  %v844_v12 = vadd.f32 %v842_v15, %v821_v8 }
 0x34c   :  { %v850_v13 = vmax.f32 %v846_v4, 0.0  ;;  %v874_v17 = vsel %vm866_vm15, %v849_v3, 0.0 }
 0x34d   :  { %v848_v14 = vmax.f32 %v844_v12, 0.0  ;;  %v872_v19 = vsel %vm866_vm15, %v847_v11, 0.0 }
 0x34e   :  { %v875_v18 = vsel %vm867_vm1, %v850_v13, 0.0 }
 0x34f   :  { %v883_v20 = vmax.f32 %v874_v17, %v875_v18  ;;  %v873_v22 = vsel %vm867_vm1, %v848_v14, 0.0 }
 0x350   :  { %v876_v23 = vmax.f32 %v872_v19, %v873_v22 }
 0x351   :  { %v884_v24 = vrot.slane %v883_v20, 4 }
 0x352   :  { %v877_v25 = vrot.slane %v876_v23, 4 }
 0x353   :  { %v885_v26 = vmax.f32 %v883_v20, %v884_v24 }
 0x354   :  { %v878_v27 = vmax.f32 %v876_v23, %v877_v25 }
 0x355   :  { %v886_v28 = vrot.slane %v885_v26, 2 }
 0x356   :  { %v879_v29 = vrot.slane %v878_v27, 2 }
 0x357   :  { %v887_v30 = vmax.f32 %v885_v26, %v886_v28 }
 0x358   :  { %v880_v31 = vmax.f32 %v878_v27, %v879_v29 }
 0x359   :  { %v888_v32 = vrot.slane %v887_v30, 1 }
 0x35a   :  { %v881_v33 = vrot.slane %v880_v31, 1 }
 0x35b   :  { %v889_v34 = vmax.f32 %v887_v30, %v888_v32 }
 0x35c   :  { %v882_v35 = vmax.f32 %v880_v31, %v881_v33 }
 0x35e   :  { %v893_v36 = vsel %vm892_vm2, %v889_v34, %v882_v35 }
 0x35f   :  { %v1088_v37 = vpack.c.bf16 %v893_v36, %v893_v36 }
 0x361   :  { %1266 = vmatmul.mubr.msk.bf16.vlgmr.msra.gmra.mrb[12].mxu1 %vm1087_vm4, %v1088_v37 }
 0x434   :  { %v1002_v40 = vpop.f32.mrb[12].mxu1 }
 0x435   :  { %v1003_v41 = vadd.f32 %v1002_v40, %v919_v5  ;;  %v1267_v6 = vpop.f32.mrb[13].mxu1 }
 0x436   :  { %v1005_v7 = vpop.f32.mrb[14].mxu1 }
 0x437   :  { %v1268_v9 = vpop.f32.mrb[15].mxu1  ;;  %v1009_v10 = vsel %vm1008_vm6, %v1003_v41, -1e+30 }
 0x438   :  { %1010 = vmax.xlane.f32.xlu0 %v1009_v10 }
 0x4c5   :  { %v1011_v42 = vpop.xlane.xlu0 %1010 }
 0x4c6   :  { %v1012_v43 = vsub.f32 %v1009_v10, %v1011_v42 }
 0x4c8   :  { %v1013_v44 = vmul.f32 1.442695, %v1012_v43 }
 0x4ca   :  { %1330 = vpow2.f32 %v1013_v44 }
 0x4d4   :  { %v1331_v45 = vpop.eup %1330 }
 0x4d5   :  { %1015 = vadd.xlane.f32.xlu1 %v1331_v45 }
 0x562   :  { %v1016_v46 = vpop.xlane.xlu1 %1015 }
 0x563   :  { %1332 = vlog2.f32 %v1016_v46 }
 0x56d   :  { %v1333_v47 = vpop.eup %1332 }
 0x56e   :  { %v1018_v48 = vmul.f32 0.6931472, %v1333_v47 }
 0x570   :  { %v1019_v49 = vsub.f32 %v1012_v43, %v1018_v48 }
 0x572   :  { %1020 = vst [vmem:[%s1588_s3] sm:$0xff] %v1019_v49 }

</bundles_post_ra>
